<compile_context>
chip_gen: v6e
topology: v6e:2x2x1
jax: 0.10.0
libtpu: 0.0.40
codegen_flags: <defaults>
</compile_context>

<pallas_src>
import functools

import jax
import jax.numpy as jnp
from jax.experimental import pallas as pl
from jax.experimental.pallas import tpu as pltpu

EPS = 1e-5


def _round_up(v, m):
    return ((v + m - 1) // m) * m


@functools.lru_cache(maxsize=None)
def _vmem_limit():
    """Per-generation VMEM limit: ~45% of physical (≈57 MiB v5e/v6e, ≈28 MiB v7x)."""
    cap = 128 * 1024 * 1024
    try:
        info = pltpu.get_tpu_info()
        cap = int(getattr(info, "vmem_capacity_bytes", cap))
    except Exception:
        pass
    return max(24 * 1024 * 1024, min(100 * 1024 * 1024, (cap * 9) // 20))


# ---------------------------------------------------------------------------
# 1. Input BatchNorm2d(1), training-mode batch statistics (two-pass variance)
# ---------------------------------------------------------------------------
def _input_bn_kernel(x_ref, g_ref, b_ref, o_ref, *, count, eps):
    x = x_ref[...]
    s = jnp.sum(jnp.sum(x, axis=1, keepdims=True), axis=0, keepdims=True)
    mean = s * (1.0 / count)
    d = x - mean
    ss = jnp.sum(jnp.sum(d * d, axis=1, keepdims=True), axis=0, keepdims=True)
    var = ss * (1.0 / count)
    scale = g_ref[...] * jax.lax.rsqrt(var + eps)
    o_ref[...] = (d * scale + b_ref[...]).astype(o_ref.dtype)


def input_bn(x2d, gamma, beta, eps=EPS):
    R, C = x2d.shape
    g = jnp.asarray(gamma, jnp.float32).reshape(1, 1)
    b = jnp.asarray(beta, jnp.float32).reshape(1, 1)
    kern = functools.partial(_input_bn_kernel, count=float(R * C), eps=eps)
    return pl.pallas_call(
        kern,
        # bf16 output: feeds the bf16 im2col patches directly (halves the write-back)
        out_shape=jax.ShapeDtypeStruct((R, C), jnp.bfloat16),
        grid=(1,),
        in_specs=[pl.BlockSpec((R, C), lambda i: (0, 0)),
                  pl.BlockSpec((1, 1), lambda i: (0, 0)),
                  pl.BlockSpec((1, 1), lambda i: (0, 0))],
        out_specs=pl.BlockSpec((R, C), lambda i: (0, 0)),
        compiler_params=pltpu.CompilerParams(
            dimension_semantics=("arbitrary",), vmem_limit_bytes=_vmem_limit()),
    )(x2d.astype(jnp.float32), g, b)


# ---------------------------------------------------------------------------
# 2. ConvBlockPooling1: Conv2d + BN(batch stats) + ReLU + MaxPool2d((2,1))
# ---------------------------------------------------------------------------
def _im2col_pool_halves(x_cnhw, KH, KW):
    """Zero-pad + im2col, split into even/odd output rows (the (2,1)-maxpool partners)."""
    Cin, N, H, W = x_cnhw.shape
    ph, pw = KH // 2, KW // 2
    Hh = H // 2
    K9 = KH * KW * Cin
    M2 = N * Hh * W
    xp = jnp.pad(x_cnhw.astype(jnp.bfloat16), ((0, 0), (0, 0), (ph, ph), (pw, pw)))
    taps = [xp[:, :, kh:kh + H, kw:kw + W] for kh in range(KH) for kw in range(KW)]
    p = jnp.stack(taps, axis=0)                      # (KH*KW, Cin, N, H, W)
    p0 = p[:, :, :, 0::2, :].reshape(K9, M2)
    p1 = p[:, :, :, 1::2, :].reshape(K9, M2)
    return p0, p1, K9, M2, Hh


def _conv_tile_bytes(K9, Cout, tm):
    # double-buffered bf16 patch halves + bf16 conv-output halves, plus the resident weight
    return 2 * (2 * K9 * tm * 2 + 2 * Cout * tm * 2) + Cout * K9 * 2


def _pick_conv_tile(K9, Cout, M2, budget):
    if _conv_tile_bytes(K9, Cout, M2) <= budget:
        return M2                                    # whole slab fits -> fully fused path
    for tm in (4096, 2048, 1024, 512, 256, 128):
        if tm < M2 and M2 % tm == 0 and _conv_tile_bytes(K9, Cout, tm) <= budget:
            return tm
    return M2                                        # fallback (see TODO on halo tiling)


def _conv_block_fused_kernel(p0_ref, p1_ref, wt_ref, b_ref, g_ref, bt_ref, o_ref, *, count, eps):
    # p0/p1: (K9, M2) bf16 im2col patches for even/odd output rows; wt: (Cout, K9) bf16
    w = wt_ref[...]
    a0 = jnp.dot(w, p0_ref[...], preferred_element_type=jnp.float32) + b_ref[...]
    a1 = jnp.dot(w, p1_ref[...], preferred_element_type=jnp.float32) + b_ref[...]
    inv = 1.0 / count
    mean = (jnp.sum(a0, axis=1, keepdims=True) + jnp.sum(a1, axis=1, keepdims=True)) * inv
    d0 = a0 - mean
    d1 = a1 - mean
    # two-pass variance (data resident -> no E[x^2]-E[x]^2 cancellation risk)
    var = (jnp.sum(d0 * d0, axis=1, keepdims=True)
           + jnp.sum(d1 * d1, axis=1, keepdims=True)) * inv
    scale = g_ref[...] * jax.lax.rsqrt(var + eps)
    z0 = jnp.maximum(d0 * scale + bt_ref[...], 0.0)
    z1 = jnp.maximum(d1 * scale + bt_ref[...], 0.0)
    o_ref[...] = jnp.maximum(z0, z1).astype(o_ref.dtype)


def _conv_stats_kernel(p0_ref, p1_ref, wt_ref, b_ref, a0_ref, a1_ref, s1_ref, s2_ref):
    @pl.when(pl.program_id(0) == 0)
    def _():
        s1_ref[...] = jnp.zeros_like(s1_ref)
        s2_ref[...] = jnp.zeros_like(s2_ref)

    w = wt_ref[...]
    acc0 = jnp.dot(w, p0_ref[...], preferred_element_type=jnp.float32)
    acc1 = jnp.dot(w, p1_ref[...], preferred_element_type=jnp.float32)
    a0_ref[...] = (acc0 + b_ref[...]).astype(a0_ref.dtype)
    a1_ref[...] = (acc1 + b_ref[...]).astype(a1_ref.dtype)
    # bias-free (better-centred) running sums; the bias is re-added to the mean in phase 2
    s1_ref[...] += (jnp.sum(acc0, axis=1, keepdims=True)
                    + jnp.sum(acc1, axis=1, keepdims=True))
    s2_ref[...] += (jnp.sum(acc0 * acc0, axis=1, keepdims=True)
                    + jnp.sum(acc1 * acc1, axis=1, keepdims=True))


def _conv_bn_apply_kernel(a0_ref, a1_ref, s1_ref, s2_ref, b_ref, g_ref, bt_ref, o_ref,
                          *, count, eps):
    inv = 1.0 / count
    mean_acc = s1_ref[...] * inv
    var = s2_ref[...] * inv - mean_acc * mean_acc
    scale = g_ref[...] * jax.lax.rsqrt(var + eps)
    shift = bt_ref[...] - (mean_acc + b_ref[...]) * scale
    z0 = jnp.maximum(a0_ref[...].astype(jnp.float32) * scale + shift, 0.0)
    z1 = jnp.maximum(a1_ref[...].astype(jnp.float32) * scale + shift, 0.0)
    o_ref[...] = jnp.maximum(z0, z1).astype(o_ref.dtype)


def conv_block(x_cnhw, w_oihw, bias, gamma, beta, eps=EPS, vmem_budget=None):
    """Activations use a channel-major (C, N, H, W) layout so the flattened N*Hh*W axis
    (dominated by time at real CRNN shapes) sits on the 128-lane axis."""
    Cin, N, H, W = x_cnhw.shape
    Cout, _, KH, KW = w_oihw.shape
    assert H % 2 == 0, "MaxPool2d((2,1)) assumes an even frequency dimension"
    p0, p1, K9, M2, Hh = _im2col_pool_halves(x_cnhw, KH, KW)
    wt = jnp.transpose(w_oihw, (0, 2, 3, 1)).reshape(Cout, K9).astype(jnp.bfloat16)
    b2 = bias.reshape(Cout, 1).astype(jnp.float32)
    g2 = gamma.reshape(Cout, 1).astype(jnp.float32)
    bt2 = beta.reshape(Cout, 1).astype(jnp.float32)
    count = float(N * H * W)
    limit = _vmem_limit()
    budget = (limit * 3) // 4 if vmem_budget is None else vmem_budget
    tm = _pick_conv_tile(K9, Cout, M2, budget)

    if tm >= M2:
        # fully fused: conv + batch-stats + BN + ReLU + (2,1) max-pool, conv output never
        # leaves VMEM.
        kern = functools.partial(_conv_block_fused_kernel, count=count, eps=eps)
        out = pl.pallas_call(
            kern,
            out_shape=jax.ShapeDtypeStruct((Cout, M2), jnp.bfloat16),
            grid=(1,),
            in_specs=[pl.BlockSpec((K9, M2), lambda i: (0, 0)),
                      pl.BlockSpec((K9, M2), lambda i: (0, 0)),
                      pl.BlockSpec((Cout, K9), lambda i: (0, 0)),
                      pl.BlockSpec((Cout, 1), lambda i: (0, 0)),
                      pl.BlockSpec((Cout, 1), lambda i: (0, 0)),
                      pl.BlockSpec((Cout, 1), lambda i: (0, 0))],
            out_specs=pl.BlockSpec((Cout, M2), lambda i: (0, 0)),
            compiler_params=pltpu.CompilerParams(
                dimension_semantics=("arbitrary",), vmem_limit_bytes=limit),
        )(p0, p1, wt, b2, g2, bt2)
    else:
        n_tiles = M2 // tm
        # Phase 1 ('arbitrary'): tiled conv matmuls + per-channel sum / sum-sq accumulators.
        a0, a1, s1, s2 = pl.pallas_call(
            _conv_stats_kernel,
            out_shape=(jax.ShapeDtypeStruct((Cout, M2), jnp.bfloat16),
                       jax.ShapeDtypeStruct((Cout, M2), jnp.bfloat16),
                       jax.ShapeDtypeStruct((Cout, 1), jnp.float32),
                       jax.ShapeDtypeStruct((Cout, 1), jnp.float32)),
            grid=(n_tiles,),
            in_specs=[pl.BlockSpec((K9, tm), lambda i: (0, i)),
                      pl.BlockSpec((K9, tm), lambda i: (0, i)),
                      pl.BlockSpec((Cout, K9), lambda i: (0, 0)),
                      pl.BlockSpec((Cout, 1), lambda i: (0, 0))],
            out_specs=(pl.BlockSpec((Cout, tm), lambda i: (0, i)),
                       pl.BlockSpec((Cout, tm), lambda i: (0, i)),
                       pl.BlockSpec((Cout, 1), lambda i: (0, 0)),
                       pl.BlockSpec((Cout, 1), lambda i: (0, 0))),
            compiler_params=pltpu.CompilerParams(
                dimension_semantics=("arbitrary",), vmem_limit_bytes=limit),
        )(p0, p1, wt, b2)
        # Phase 2 ('parallel', 2-TC shardable on v7x): BN + ReLU + (2,1) max-pool apply.
        kern = functools.partial(_conv_bn_apply_kernel, count=count, eps=eps)
        out = pl.pallas_call(
            kern,
            out_shape=jax.ShapeDtypeStruct((Cout, M2), jnp.bfloat16),
            grid=(n_tiles,),
            in_specs=[pl.BlockSpec((Cout, tm), lambda i: (0, i)),
                      pl.BlockSpec((Cout, tm), lambda i: (0, i)),
                      pl.BlockSpec((Cout, 1), lambda i: (0, 0)),
                      pl.BlockSpec((Cout, 1), lambda i: (0, 0)),
                      pl.BlockSpec((Cout, 1), lambda i: (0, 0)),
                      pl.BlockSpec((Cout, 1), lambda i: (0, 0)),
                      pl.BlockSpec((Cout, 1), lambda i: (0, 0))],
            out_specs=pl.BlockSpec((Cout, tm), lambda i: (0, i)),
            compiler_params=pltpu.CompilerParams(
                dimension_semantics=("parallel",), vmem_limit_bytes=limit),
        )(a0, a1, s1, s2, b2, g2, bt2)
    return out.reshape(Cout, N, Hh, W)


# ---------------------------------------------------------------------------
# 3. Linear (bf16 matmul + bias, f32 accumulate) — fused GRU input projection
# ---------------------------------------------------------------------------
def _linear_kernel(x_ref, w_ref, b_ref, o_ref):
    o_ref[...] = (jnp.dot(x_ref[...], w_ref[...], preferred_element_type=jnp.float32)
                  + b_ref[...]).astype(o_ref.dtype)


def linear(x, w, b, tile_m=256):
    M, K = x.shape
    N = w.shape[1]
    tm = min(tile_m, _round_up(M, 8))
    Mp = _round_up(M, tm)
    xb = x.astype(jnp.bfloat16)
    if Mp != M:
        xb = jnp.pad(xb, ((0, Mp - M), (0, 0)))
    out = pl.pallas_call(
        _linear_kernel,
        out_shape=jax.ShapeDtypeStruct((Mp, N), jnp.float32),
        grid=(Mp // tm,),
        in_specs=[pl.BlockSpec((tm, K), lambda i: (i, 0)),
                  pl.BlockSpec((K, N), lambda i: (0, 0)),
                  pl.BlockSpec((1, N), lambda i: (0, 0))],
        out_specs=pl.BlockSpec((tm, N), lambda i: (i, 0)),
        compiler_params=pltpu.CompilerParams(
            dimension_semantics=("parallel",), vmem_limit_bytes=_vmem_limit()),
    )(xb, w.astype(jnp.bfloat16), b.astype(jnp.float32))
    return out[:M] if Mp != M else out


# ---------------------------------------------------------------------------
# 4. Bidirectional GRU recurrence: one pallas_call, grid=(2,) over directions ('parallel'),
#    in-kernel lax.fori_loop over time, bf16 W_hh with f32 accumulation / f32 hidden state.
# ---------------------------------------------------------------------------
def _gru_dir_kernel(xg_ref, whh_ref, bhh_ref, hout_ref, *, hidden, steps):
    rev = pl.program_id(0)                  # 0 = forward, 1 = time-reversed backward
    whh = whh_ref[...]                      # (H, 3H) bf16, VMEM-resident across all steps
    bhh = bhh_ref[...]                      # (1, 3H) f32
    batch = xg_ref.shape[1]

    def step(t, h):
        tt = jnp.where(rev == 0, t, steps - 1 - t)
        gx = xg_ref[tt]                     # (B, 3H) f32
        gh = jnp.dot(h.astype(jnp.bfloat16), whh,
                     preferred_element_type=jnp.float32) + bhh
        r = jax.nn.sigmoid(gx[:, 0:hidden] + gh[:, 0:hidden])
        z = jax.nn.sigmoid(gx[:, hidden:2 * hidden] + gh[:, hidden:2 * hidden])
        n = jnp.tanh(gx[:, 2 * hidden:3 * hidden] + r * gh[:, 2 * hidden:3 * hidden])
        h_new = (1.0 - z) * n + z * h
        hout_ref[tt] = h_new
        return h_new

    jax.lax.fori_loop(0, steps, step, jnp.zeros((batch, hidden), jnp.float32))


def gru_bidir(xg, whh_t, bhh, hidden):
    # xg: (2, T, B, 3H) f32 ; whh_t: (2, H, 3H) bf16 ; bhh: (2, 1, 3H) f32
    _, T, B, G = xg.shape
    kern = functools.partial(_gru_dir_kernel, hidden=hidden, steps=T)
    return pl.pallas_call(
        kern,
        out_shape=jax.ShapeDtypeStruct((2, T, B, hidden), jnp.float32),
        grid=(2,),
        in_specs=[pl.BlockSpec((None, T, B, G), lambda d: (d, 0, 0, 0)),
                  pl.BlockSpec((None, hidden, G), lambda d: (d, 0, 0)),
                  pl.BlockSpec((None, 1, G), lambda d: (d, 0, 0))],
        out_specs=pl.BlockSpec((None, T, B, hidden), lambda d: (d, 0, 0, 0)),
        compiler_params=pltpu.CompilerParams(
            dimension_semantics=("parallel",), vmem_limit_bytes=_vmem_limit()),
    )(xg, whh_t, bhh)


# ---------------------------------------------------------------------------
# 5. Head: FC + sigmoid + clamp + linear_softmax_pooling (fused, lane-dense padded classes)
# ---------------------------------------------------------------------------
def _head_kernel(h_ref, w_ref, b_ref, time_ref, clip_ref):
    logits = jnp.dot(h_ref[...], w_ref[...], preferred_element_type=jnp.float32) + b_ref[...]
    p = jnp.clip(jax.nn.sigmoid(logits), 1e-7, 1.0)
    time_ref[...] = p
    clip_ref[...] = jnp.sum(p * p, axis=0, keepdims=True) / jnp.sum(p, axis=0, keepdims=True)


def head(hcat, wfc, bfc):
    B, T, F = hcat.shape
    C = wfc.shape[1]
    Cp = _round_up(max(C, 128), 128)      # lane-dense class axis (no masked partial stores)
    wp = jnp.pad(wfc.astype(jnp.bfloat16), ((0, 0), (0, Cp - C)))
    bp = jnp.pad(bfc.reshape(1, -1).astype(jnp.float32), ((0, 0), (0, Cp - C)))
    time_p, clip_p = pl.pallas_call(
        _head_kernel,
        out_shape=(jax.ShapeDtypeStruct((B, T, Cp), jnp.float32),
                   jax.ShapeDtypeStruct((B, 1, Cp), jnp.float32)),
        grid=(B,),
        in_specs=[pl.BlockSpec((None, T, F), lambda b: (b, 0, 0)),
                  pl.BlockSpec((F, Cp), lambda b: (0, 0)),
                  pl.BlockSpec((1, Cp), lambda b: (0, 0))],
        out_specs=(pl.BlockSpec((None, T, Cp), lambda b: (b, 0, 0)),
                   pl.BlockSpec((None, 1, Cp), lambda b: (b, 0, 0))),
        compiler_params=pltpu.CompilerParams(
            dimension_semantics=("parallel",), vmem_limit_bytes=_vmem_limit()),
    )(hcat.astype(jnp.bfloat16), wp, bp)
    return time_p[:, :, :C], clip_p[:, 0, :C]


# ---------------------------------------------------------------------------
# Full model forward (wrapper = layout plumbing only)
# ---------------------------------------------------------------------------
def crnn_forward(x, params, hidden=512, conv_vmem_budget=None):
    """x: (batch, time, num_freq) — matches Crnn_256_pooling1.forward input."""
    B, T, F0 = x.shape

    xbn = input_bn(x.reshape(B * T, F0), params['bn0_gamma'], params['bn0_beta'])
    # (b,t,f) -> NCHW (b,1,f,t) -> channel-major (C=1, N=b, H=f, W=t) for the conv kernels
    h = jnp.transpose(xbn.reshape(B, T, F0), (0, 2, 1))[None]

    for i in range(1, 6):
        h = conv_block(h, params[f'conv{i}_w'], params[f'conv{i}_b'],
                       params[f'bn{i}_gamma'], params[f'bn{i}_beta'],
                       vmem_budget=conv_vmem_budget)
    # h: (256, B, num_freq/32, T); PyTorch reshape(b, C*H, t).transpose(1,2) => f = c*H + h
    C5, _, H5, _ = h.shape
    feats = jnp.transpose(h, (1, 3, 0, 2)).reshape(B, T, C5 * H5)     # (B, T, 512) bf16

    # fused bidirectional GRU input projection: ONE (B*T, feat) @ (feat, 6H) bf16 matmul
    wih = jnp.concatenate([params['gru_wih_f'], params['gru_wih_b']], axis=0)   # (6H, feat)
    bih = jnp.concatenate([params['gru_bih_f'], params['gru_bih_b']], axis=0)   # (6H,)
    gx = linear(feats.reshape(B * T, C5 * H5), wih.T, bih.reshape(1, -1))       # (B*T, 6H) f32
    gx = jnp.transpose(gx.reshape(B, T, 6 * hidden), (1, 0, 2))                 # (T, B, 6H)
    xg = jnp.stack([gx[..., :3 * hidden], gx[..., 3 * hidden:]], axis=0)        # (2, T, B, 3H)

    whh = jnp.stack([params['gru_whh_f'].T, params['gru_whh_b'].T],
                    axis=0).astype(jnp.bfloat16)                                # (2, H, 3H)
    bhh = jnp.stack([params['gru_bhh_f'], params['gru_bhh_b']],
                    axis=0).reshape(2, 1, 3 * hidden).astype(jnp.float32)
    hs = gru_bidir(xg, whh, bhh, hidden)                                        # (2, T, B, H)
    hcat = jnp.concatenate([jnp.transpose(hs[0], (1, 0, 2)),
                            jnp.transpose(hs[1], (1, 0, 2))], axis=-1)          # (B, T, 1024)

    time_probs, clip_probs = head(hcat, params['fc_w'].T, params['fc_b'])
    return {'clip_probs': clip_probs, 'time_probs': time_probs}


# ---------------------------------------------------------------------------
# Pure-JAX reference (f32, matches PyTorch training-mode forward)
# ---------------------------------------------------------------------------
def reference_forward(x, params, hidden=512, eps=EPS):
    B, T, F0 = x.shape
    h = jnp.transpose(x, (0, 2, 1))[:, None].astype(jnp.float32)    # (B,1,F0,T)
    m = jnp.mean(h)
    v = jnp.mean((h - m) ** 2)
    h = (h - m) / jnp.sqrt(v + eps) * params['bn0_gamma'] + params['bn0_beta']
    for i in range(1, 6):
        w, b = params[f'conv{i}_w'], params[f'conv{i}_b']
        h = jax.lax.conv_general_dilated(
            h, w, (1, 1), 'SAME', dimension_numbers=('NCHW', 'OIHW', 'NCHW'),
            precision=jax.lax.Precision.HIGHEST) + b[None, :, None, None]
        mu = jnp.mean(h, axis=(0, 2, 3), keepdims=True)
        var = jnp.mean((h - mu) ** 2, axis=(0, 2, 3), keepdims=True)
        h = (h - mu) / jnp.sqrt(var + eps) * params[f'bn{i}_gamma'][None, :, None, None] \
            + params[f'bn{i}_beta'][None, :, None, None]
        h = jnp.maximum(h, 0.0)
        h = jax.lax.reduce_window(h, -jnp.inf, jax.lax.max, (1, 1, 2, 1), (1, 1, 2, 1), 'VALID')
    C5, H5 = h.shape[1], h.shape[2]
    feats = jnp.transpose(h.reshape(B, C5 * H5, T), (0, 2, 1))

    def gru_dir(x_seq, wih, whh, bih, bhh):
        gx = jnp.einsum('tbf,gf->tbg', x_seq, wih) + bih

        def step(hprev, gx_t):
            gh = hprev @ whh.T + bhh
            r = jax.nn.sigmoid(gx_t[:, :hidden] + gh[:, :hidden])
            z = jax.nn.sigmoid(gx_t[:, hidden:2 * hidden] + gh[:, hidden:2 * hidden])
            n = jnp.tanh(gx_t[:, 2 * hidden:] + r * gh[:, 2 * hidden:])
            hn = (1.0 - z) * n + z * hprev
            return hn, hn

        h0 = jnp.zeros((x_seq.shape[1], hidden), jnp.float32)
        _, hs = jax.lax.scan(step, h0, gx)
        return hs

    xs = jnp.transpose(feats, (1, 0, 2))
    hf = gru_dir(xs, params['gru_wih_f'], params['gru_whh_f'],
                 params['gru_bih_f'], params['gru_bhh_f'])
    hb = gru_dir(xs[::-1], params['gru_wih_b'], params['gru_whh_b'],
                 params['gru_bih_b'], params['gru_bhh_b'])[::-1]
    hcat = jnp.transpose(jnp.concatenate([hf, hb], axis=-1), (1, 0, 2))
    logits = hcat @ params['fc_w'].T + params['fc_b']
    p = jnp.clip(jax.nn.sigmoid(logits), 1e-7, 1.0)
    clip = jnp.sum(p * p, axis=1) / jnp.sum(p, axis=1)
    return {'clip_probs': clip, 'time_probs': p}


def init_params(key, num_freq, class_num, ks=3, hidden=512):
    chans = [1, 16, 32, 64, 128, 256]
    keys = iter(jax.random.split(key, 40))
    p = {}
    p['bn0_gamma'] = 1.0 + 0.1 * jax.random.normal(next(keys), (), jnp.float32)
    p['bn0_beta'] = 0.1 * jax.random.normal(next(keys), (), jnp.float32)
    for i in range(1, 6):
        cin, cout = chans[i - 1], chans[i]
        bnd = 1.0 / (cin * ks * ks) ** 0.5
        p[f'conv{i}_w'] = jax.random.uniform(next(keys), (cout, cin, ks, ks), jnp.float32, -bnd, bnd)
        p[f'conv{i}_b'] = jax.random.uniform(next(keys), (cout,), jnp.float32, -bnd, bnd)
        p[f'bn{i}_gamma'] = 1.0 + 0.1 * jax.random.normal(next(keys), (cout,), jnp.float32)
        p[f'bn{i}_beta'] = 0.1 * jax.random.normal(next(keys), (cout,), jnp.float32)
    feat = num_freq * 8
    kb = 1.0 / hidden ** 0.5
    for d in ('f', 'b'):
        p[f'gru_wih_{d}'] = jax.random.uniform(next(keys), (3 * hidden, feat), jnp.float32, -kb, kb)
        p[f'gru_whh_{d}'] = jax.random.uniform(next(keys), (3 * hidden, hidden), jnp.float32, -kb, kb)
        p[f'gru_bih_{d}'] = jax.random.uniform(next(keys), (3 * hidden,), jnp.float32, -kb, kb)
        p[f'gru_bhh_{d}'] = jax.random.uniform(next(keys), (3 * hidden,), jnp.float32, -kb, kb)
    kf = 1.0 / (2 * hidden) ** 0.5
    p['fc_w'] = jax.random.uniform(next(keys), (class_num, 2 * hidden), jnp.float32, -kf, kf)
    p['fc_b'] = jax.random.uniform(next(keys), (class_num,), jnp.float32, -kf, kf)
    return p


if __name__ == "__main__":
    B, T, NUM_FREQ, CLASS_NUM, KS = 2, 16, 64, 10, 3

    key = jax.random.PRNGKey(0)
    kx, kp = jax.random.split(key)
    x = jax.random.normal(kx, (B, T, NUM_FREQ), dtype=jnp.float32)
    params = init_params(kp, NUM_FREQ, CLASS_NUM, KS)

    ref = jax.block_until_ready(reference_forward(x, params))

    # default path (all conv blocks fit VMEM -> fully fused conv kernels)
    out = jax.block_until_ready(crnn_forward(x, params))
    # also exercise the tiled two-phase conv path (forced small VMEM budget for tile choice)
    out_tiled = jax.block_until_ready(crnn_forward(x, params, conv_vmem_budget=128 * 1024))

    for o in (out, out_tiled):
        assert o['time_probs'].shape == (B, T, CLASS_NUM), o['time_probs'].shape
        assert o['clip_probs'].shape == (B, CLASS_NUM), o['clip_probs'].shape
        err_t = float(jnp.max(jnp.abs(o['time_probs'] - ref['time_probs'])))
        err_c = float(jnp.max(jnp.abs(o['clip_probs'] - ref['clip_probs'])))
        assert err_t < 3e-2 and err_c < 3e-2, (err_t, err_c)

    print("KERNEL_OK")
</pallas_src>

<mosaic_0001>
module attributes {stable_mosaic.version = 11 : i64} {
  func.func @_input_bn_kernel(%arg0: i32, %arg1: memref<32x64xf32, #tpu.memory_space<vmem>>, %arg2: memref<1x1xf32, #tpu.memory_space<vmem>>, %arg3: memref<1x1xf32, #tpu.memory_space<vmem>>, %arg4: memref<32x64xbf16, #tpu.memory_space<vmem>>) attributes {dimension_semantics = [#tpu.dimension_semantics<arbitrary>], iteration_bounds = array<i64: 1>, scalar_prefetch = 0 : i64, scratch_operands = 0 : i64, tpu.core_type = #tpu.core_type<tc>, window_params = [{pipeline_mode = #tpu.pipeline_mode<synchronous>, transform_indices = @transform_0, window_bounds = array<i64: 32, 64>}, {pipeline_mode = #tpu.pipeline_mode<synchronous>, transform_indices = @transform_1, window_bounds = array<i64: 1, 1>}, {pipeline_mode = #tpu.pipeline_mode<synchronous>, transform_indices = @transform_2, window_bounds = array<i64: 1, 1>}, {pipeline_mode = #tpu.pipeline_mode<synchronous>, transform_indices = @transform_3, window_bounds = array<i64: 32, 64>}]} {
    %c0 = arith.constant 0 : index
    %c0_0 = arith.constant 0 : index
    %0 = vector.load %arg1[%c0, %c0_0] : memref<32x64xf32, #tpu.memory_space<vmem>>, vector<32x64xf32>
    %cst = arith.constant dense<0.000000e+00> : vector<32xf32>
    %1 = vector.multi_reduction <add>, %0, %cst [1] : vector<32x64xf32> to vector<32xf32>
    %2 = vector.shape_cast %1 : vector<32xf32> to vector<32x1xf32>
    %cst_1 = arith.constant dense<0.000000e+00> : vector<1xf32>
    %3 = vector.multi_reduction <add>, %2, %cst_1 [0] : vector<32x1xf32> to vector<1xf32>
    %4 = vector.shape_cast %3 : vector<1xf32> to vector<1x1xf32>
    %cst_2 = arith.constant 4.8828125E-4 : f32
    %5 = vector.broadcast %cst_2 : f32 to vector<1x1xf32>
    %6 = arith.mulf %4, %5 : vector<1x1xf32>
    %7 = vector.broadcast %6 : vector<1x1xf32> to vector<32x64xf32>
    %8 = arith.subf %0, %7 : vector<32x64xf32>
    %9 = arith.mulf %8, %8 : vector<32x64xf32>
    %cst_3 = arith.constant dense<0.000000e+00> : vector<32xf32>
    %10 = vector.multi_reduction <add>, %9, %cst_3 [1] : vector<32x64xf32> to vector<32xf32>
    %11 = vector.shape_cast %10 : vector<32xf32> to vector<32x1xf32>
    %cst_4 = arith.constant dense<0.000000e+00> : vector<1xf32>
    %12 = vector.multi_reduction <add>, %11, %cst_4 [0] : vector<32x1xf32> to vector<1xf32>
    %13 = vector.shape_cast %12 : vector<1xf32> to vector<1x1xf32>
    %cst_5 = arith.constant 4.8828125E-4 : f32
    %14 = vector.broadcast %cst_5 : f32 to vector<1x1xf32>
    %15 = arith.mulf %13, %14 : vector<1x1xf32>
    %c0_6 = arith.constant 0 : index
    %c0_7 = arith.constant 0 : index
    %16 = vector.load %arg2[%c0_6, %c0_7] : memref<1x1xf32, #tpu.memory_space<vmem>>, vector<1x1xf32>
    %cst_8 = arith.constant 9.99999974E-6 : f32
    %17 = vector.broadcast %cst_8 : f32 to vector<1x1xf32>
    %18 = arith.addf %15, %17 : vector<1x1xf32>
    %19 = math.rsqrt %18 : vector<1x1xf32>
    %20 = arith.mulf %16, %19 : vector<1x1xf32>
    %21 = vector.broadcast %20 : vector<1x1xf32> to vector<32x64xf32>
    %22 = arith.mulf %8, %21 : vector<32x64xf32>
    %c0_9 = arith.constant 0 : index
    %c0_10 = arith.constant 0 : index
    %23 = vector.load %arg3[%c0_9, %c0_10] : memref<1x1xf32, #tpu.memory_space<vmem>>, vector<1x1xf32>
    %24 = vector.broadcast %23 : vector<1x1xf32> to vector<32x64xf32>
    %25 = arith.addf %22, %24 : vector<32x64xf32>
    %26 = arith.truncf %25 : vector<32x64xf32> to vector<32x64xbf16>
    %c0_11 = arith.constant 0 : index
    %c0_12 = arith.constant 0 : index
    %27 = vector.load %arg4[%c0_11, %c0_12] : memref<32x64xbf16, #tpu.memory_space<vmem>>, vector<32x64xbf16>
    tpu.vector_store %arg4[%c0_11, %c0_12], %26 {strides = array<i32>} : memref<32x64xbf16, #tpu.memory_space<vmem>>, vector<32x64xbf16>,
    return
  }
  func.func @transform_0(%arg0: i32) -> (i32, i32) {
    %c0_i32 = arith.constant 0 : i32
    %c0_i32_0 = arith.constant 0 : i32
    %c0_i32_1 = arith.constant 0 : i32
    return %c0_i32, %c0_i32_0 : i32, i32
  }
  func.func @transform_1(%arg0: i32) -> (i32, i32) {
    %c0_i32 = arith.constant 0 : i32
    %c0_i32_0 = arith.constant 0 : i32
    %c0_i32_1 = arith.constant 0 : i32
    return %c0_i32, %c0_i32_0 : i32, i32
  }
  func.func @transform_2(%arg0: i32) -> (i32, i32) {
    %c0_i32 = arith.constant 0 : i32
    %c0_i32_0 = arith.constant 0 : i32
    %c0_i32_1 = arith.constant 0 : i32
    return %c0_i32, %c0_i32_0 : i32, i32
  }
  func.func @transform_3(%arg0: i32) -> (i32, i32) {
    %c0_i32 = arith.constant 0 : i32
    %c0_i32_0 = arith.constant 0 : i32
    %c0_i32_1 = arith.constant 0 : i32
    return %c0_i32, %c0_i32_0 : i32, i32
  }
}

</mosaic_0001>

<bundles_post_ra>
// kernel: tpu_custom_call.1
= control target key start
LH: loop header
LB: loop body
LE: loop exit
PB: predicated region body
PF: predicated region fallthrough
CT: control target
= control target key end

     0   :  { %s270_s0 = inlined_call_operand.hbm [shape: f32[32,64], index: 0, kind: input, shape index: {}]   ;;  %s271_s1 = inlined_call_operand.<no memory space> [shape: f32[1,1], index: 1, kind: input, shape index: {}]   ;;  %s272_s3 = inlined_call_operand.hbm [shape: bf16[32,64], index: 3, kind: output, shape index: {}]   ;;  %s273_s2 = inlined_call_operand.<no memory space> [shape: f32[1,1], index: 2, kind: input, shape index: {}]  }
   0x1   :  { %v8_v0 = vstv %s271_s1  ;;  %v10_v1 = vstv %s273_s2 }
   0x2   :  { %9 = vst [vmem:[#allocation2] sm:$0x1] %v8_v0  ;;  %11 = vst [vmem:[#allocation3] sm:$0x1] %v10_v1 }
   0x3   :  { %12 = vsyncpa [#allocation5], 0 }
   0x4   :  { %13 = vsyncpa [#allocation6], 0  ;;  %s223_s16 = smov [#allocation4]  }
   0x5   :  { %s19_s17 = sshll.u32 %s223_s16, 4  ;;  %s20_s17 = int_to_ptr.vmem [resolvable:$true] %s19_s17 }
   0x6   :  { %s187_s18 = scalar_lea.vmem %s20_s17, 512  ;;  %p192_p1 = scmp.lt.s32.totalorder %s20_s17, %s20_s17 }
   0x7   :  { %p188_p0 = scmp.ne.s32.totalorder %s20_s17, %s187_s18  ;;  %p193_p2 = scmp.lt.s32.totalorder %s187_s18, %s187_s18 }
   0x9   :  { %p194_p3 = por %p193_p2, %p192_p1 }
   0xb   :  { %p195_p4 = pnand %p194_p3, %p188_p0 }
   0xd   :  { %198 = shalt.err (!%p195_p4)
}
   0xe   :  { %s224_s19 = smov 128   ;;  %s225_s1 = smov 8  }
   0xf   :  { %25 = dma.hbm_to_vmem [thread:$0]  %s270_s0, 512, %s20_s17, [#allocation5], %s224_s19, %s224_s19, %s225_s1  }
  0x10   :  { %219 = dma.done.wait [#allocation5], 512  }
  0x11   :  { %220 = vsyncadd [#allocation5], 4294966784  ;;  %vm37_vm0 = vcmask 523264   ;;  %v33_v2 = vld [vmem:[#allocation4] sm:$0xff]  ;;  %v35_v3 = vld [vmem:[#allocation4 + $0x10] sm:$0xff]  ;;  %v226_v36 = vmov 0   ;;  %v95_v53 = vlaneseq }
  0x12   :  { %v34_v4 = vld [vmem:[#allocation4 + $0x8] sm:$0xff]  ;;  %v38_v5 = vsel %vm37_vm0, %v33_v2, 0.0  ;;  %v44_v6 = vsel %vm37_vm0, %v35_v3, 0.0  ;;  %v36_v7 = vld [vmem:[#allocation4 + $0x18] sm:$0xff]  ;;  %175 = vset.pattern.permute.xlu0 %v226_v36  ;;  %176 = vset.pattern.permute.xlu1 %v226_v36  ;;  %s227_s0 = smov [#allocation7]   ;;  %vm137_vm1 = vcmask 519168  }
  0x13   :  { %39 = vadd.xlane.f32.xlu0 %v38_v5  ;;  %45 = vadd.xlane.f32.xlu1 %v44_v6  ;;  %v41_v8 = vsel %vm37_vm0, %v34_v4, 0.0  ;;  %v47_v9 = vsel %vm37_vm0, %v36_v7, 0.0  ;;  %v159_v37 = vld [vmem:[#allocation3] ss:$0 sm:$0xff]  ;;  %v96_v54 = vshrl.u32 %v95_v53, 7  ;;  %s147_s2 = sshll.u32 %s227_s0, 4  ;;  %s148_s2 = int_to_ptr.vmem [resolvable:$true] %s147_s2 }
  0x14   :  { %v90_v55 = vld [vmem:[#allocation2] sm:$0x1]  ;;  %s199_s22 = scalar_lea.vmem %s148_s2, 256  ;;  %p204_p6 = scmp.lt.s32.totalorder %s148_s2, %s148_s2 }
  0x15   :  { %v97_v56 = vsub.s32 0, %v96_v54  ;;  %p200_p5 = scmp.ne.s32.totalorder %s148_s2, %s199_s22  ;;  %p205_p7 = scmp.lt.s32.totalorder %s199_s22, %s199_s22 }
  0x17   :  { %42 = vadd.xlane.f32.xlu0 %v41_v8  ;;  %48 = vadd.xlane.f32.xlu1 %v47_v9  ;;  %p206_p8 = por %p205_p7, %p204_p6 }
  0x19   :  { %p207_p9 = pnand %p206_p8, %p200_p5 }
  0x9c   :  { %v40_v10 = vpop.xlane.xlu0 %39  ;;  %v46_v11 = vpop.xlane.xlu1 %45 }
  0xa0   :  { %v43_v12 = vpop.xlane.xlu0 %42  ;;  %v49_v14 = vpop.xlane.xlu1 %48 }
  0xa1   :  { %v50_v13 = vadd.f32 %v43_v12, %v40_v10 }
  0xa3   :  { %v51_v15 = vadd.f32 %v50_v13, %v46_v11 }
  0xa5   :  { %v52_v16 = vadd.f32 %v51_v15, %v49_v14 }
  0xa7   :  { %v53_v17 = vrot.slane %v52_v16, 4 }
  0xa9   :  { %v54_v18 = vadd.f32 %v53_v17, %v52_v16 }
  0xab   :  { %v55_v19 = vrot.slane %v54_v18, 2 }
  0xad   :  { %v56_v20 = vadd.f32 %v55_v19, %v54_v18 }
  0xaf   :  { %v57_v21 = vrot.slane %v56_v20, 1 }
  0xb1   :  { %v58_v22 = vadd.f32 %v57_v21, %v56_v20 }
  0xb3   :  { %v59_v23 = vmul.f32 0.00048828125, %v58_v22 }
  0xb5   :  { %v61_v24 = vsub.f32 %v34_v4, %v59_v23  ;;  %v60_v25 = vsub.f32 %v33_v2, %v59_v23  ;;  %v63_v26 = vsub.f32 %v36_v7, %v59_v23  ;;  %v62_v27 = vsub.f32 %v35_v3, %v59_v23 }
  0xb7   :  { %v65_v28 = vmul.f32 %v61_v24, %v61_v24  ;;  %v64_v29 = vmul.f32 %v60_v25, %v60_v25  ;;  %v67_v32 = vmul.f32 %v63_v26, %v63_v26  ;;  %v66_v33 = vmul.f32 %v62_v27, %v62_v27 }
  0xb9   :  { %v71_v30 = vsel %vm37_vm0, %v65_v28, 0.0  ;;  %v68_v31 = vsel %vm37_vm0, %v64_v29, 0.0  ;;  %v77_v34 = vsel %vm37_vm0, %v67_v32, 0.0  ;;  %v74_v35 = vsel %vm37_vm0, %v66_v33, 0.0 }
  0xba   :  { %72 = vadd.xlane.f32.xlu1 %v71_v30  ;;  %69 = vadd.xlane.f32.xlu0 %v68_v31 }
  0xbe   :  { %78 = vadd.xlane.f32.xlu1 %v77_v34  ;;  %75 = vadd.xlane.f32.xlu0 %v74_v35 }
  0xcf   :  { %114 = vperm.xlu1 %176, %v159_v37  }
 0x143   :  { %v73_v38 = vpop.xlane.xlu1 %72  ;;  %v70_v39 = vpop.xlane.xlu0 %69 }
 0x144   :  { %v80_v40 = vadd.f32 %v73_v38, %v70_v39 }
 0x147   :  { %v76_v41 = vpop.xlane.xlu0 %75  ;;  %v79_v43 = vpop.xlane.xlu1 %78 }
 0x148   :  { %v81_v42 = vadd.f32 %v80_v40, %v76_v41 }
 0x14a   :  { %v82_v44 = vadd.f32 %v81_v42, %v79_v43 }
 0x14b   :  { %v115_v61 = vpop.permute.xlu1 %114 }
 0x14c   :  { %v83_v45 = vrot.slane %v82_v44, 4 }
 0x14e   :  { %v84_v46 = vadd.f32 %v83_v45, %v82_v44 }
 0x150   :  { %v85_v47 = vrot.slane %v84_v46, 2 }
 0x152   :  { %v86_v48 = vadd.f32 %v85_v47, %v84_v46 }
 0x154   :  { %v87_v49 = vrot.slane %v86_v48, 1 }
 0x156   :  { %v88_v50 = vadd.f32 %v87_v49, %v86_v48 }
 0x158   :  { %v89_v51 = vmul.f32 0.00048828125, %v88_v50 }
 0x15a   :  { %v91_v52 = vadd.f32 1e-05, %v89_v51 }
 0x15c   :  { %177 = vrsqrt.f32 %v91_v52 }
 0x169   :  { %v178_v57 = vpop.eup %177 }
 0x16a   :  { %v93_v58 = vmul.f32 %v178_v57, %v90_v55 }
 0x16c   :  { %v98_v59 = vrot.slane %v93_v58, %v97_v56 }
 0x16e   :  { %100 = vperm.xlu0 %175, %v98_v59  }
 0x1e9   :  { %v101_v60 = vpop.permute.xlu0 %100 }
 0x1ea   :  { %v103_v62 = vmul.f32 %v101_v60, %v60_v25  ;;  %v104_v63 = vmul.f32 %v101_v60, %v61_v24  ;;  %v105_v0 = vmul.f32 %v101_v60, %v62_v27  ;;  %v106_v1 = vmul.f32 %v101_v60, %v63_v26 }
 0x1ec   :  { %v117_v2 = vadd.f32 %v115_v61, %v103_v62  ;;  %v118_v3 = vadd.f32 %v115_v61, %v104_v63  ;;  %v119_v4 = vadd.f32 %v115_v61, %v105_v0  ;;  %v120_v5 = vadd.f32 %v115_v61, %v106_v1 }
 0x1ee   :  { %v164_v6 = vpack.c.bf16 %v117_v2, %v117_v2  ;;  %v165_v7 = vpack.c.bf16 %v118_v3, %v118_v3  ;;  %v166_v8 = vpack.c.bf16 %v119_v4, %v119_v4  ;;  %v167_v9 = vpack.c.bf16 %v120_v5, %v120_v5 }
 0x1f0   :  { %138 = vst.msk [vmem:[#allocation7] sm:$0xf] %vm137_vm1, %v164_v6  ;;  %139 = vst.msk [vmem:[#allocation7 + $0x4] sm:$0xf] %vm137_vm1, %v165_v7 }
 0x1f1   :  { %140 = vst.msk [vmem:[#allocation7 + $0x8] sm:$0xf] %vm137_vm1, %v166_v8  ;;  %141 = vst.msk [vmem:[#allocation7 + $0xc] sm:$0xf] %vm137_vm1, %v167_v9 }
 0x1f2   :  { %210 = shalt.err (!%p207_p9)
}
 0x1f3   :  { %s228_s23 = smov 64   ;;  %s229_s24 = smov 4  }
 0x1f4   :  { %153 = dma.vmem_to_hbm [thread:$0]  %s148_s2, 256, %s272_s3, [#allocation6], %s228_s23, %s228_s23, %s229_s24  }
 0x1f5   :  { %221 = dma.done.wait [#allocation6], 256  }
 0x1f6   :  { %222 = vsyncadd [#allocation6], 4294967040 }
 0x1f7   :  { %157 = vsyncpa [#allocation5], 1 }
 0x1f8   :  { %158 = vsyncpa [#allocation6], 1 }

</bundles_post_ra>
